<compile_context>
chip_gen: v6e
topology: v6e:2x2x1
jax: 0.10.0
libtpu: 0.0.40
codegen_flags: <defaults>
</compile_context>

<pallas_src>
import functools

import jax
import jax.numpy as jnp
from jax import lax
from jax.experimental import pallas as pl
from jax.experimental.pallas import tpu as pltpu

EPS = 1e-5  # nn.BatchNorm1d default eps


# --------------------------------------------------------------------------
# Small helpers
# --------------------------------------------------------------------------
def _round_up(v, m):
    return (v + m - 1) // m * m


def _padded_bytes(shape, elem_bytes=4):
    r, c = shape
    return elem_bytes * _round_up(r, 8) * _round_up(c, 128)


def _vmem_capacity_bytes():
    try:
        return int(pltpu.get_tpu_info().vmem_capacity_bytes)
    except Exception:
        return 64 << 20  # conservative fallback (v7x has the smallest VMEM)


def _tensorcores_per_chip():
    try:
        kind = jax.devices()[0].device_kind.lower()
    except Exception:
        return 1
    # v7x exposes 2 TensorCores per chip; v5e/v6e have 1.
    return 2 if ("v7" in kind or "7x" in kind) else 1


# --------------------------------------------------------------------------
# Kernels (BN already folded into w2/w3/biases by the wrapper)
# --------------------------------------------------------------------------
def _fcn10_kernel_bm(x_ref, w1_ref, w2_ref, w3_ref, bias_ref, o_ref,
                     *, f1, f2, n_out):
    """Batch-major fused fc1+tanh -> fc2+tanh -> fc3 (small-B, no grid)."""
    x = x_ref[...]
    h1 = jnp.tanh(jnp.dot(x, w1_ref[...], preferred_element_type=jnp.float32)
                  + bias_ref[0:1, :f1])
    h2 = jnp.tanh(jnp.dot(h1, w2_ref[...], preferred_element_type=jnp.float32)
                  + bias_ref[1:2, :f2])
    o_ref[...] = (jnp.dot(h2, w3_ref[...], preferred_element_type=jnp.float32)
                  + bias_ref[2:3, :n_out])


def _fcn10_kernel_fm(xT_ref, w1T_ref, w2T_ref, w3T_ref, bias_ref, oT_ref,
                     *, f1, f2, n_out):
    """Feature-major fused forward: batch on lanes (dense 128-multiple tiles)."""
    xT = xT_ref[...]                                                 # (n_in, tb)
    h1 = jnp.tanh(jnp.dot(w1T_ref[...], xT,
                          preferred_element_type=jnp.float32)
                  + bias_ref[:f1, 0:1])                              # (f1, tb)
    h2 = jnp.tanh(jnp.dot(w2T_ref[...], h1,
                          preferred_element_type=jnp.float32)
                  + bias_ref[:f2, 1:2])                              # (f2, tb)
    oT_ref[...] = (jnp.dot(w3T_ref[...], h2,
                           preferred_element_type=jnp.float32)
                   + bias_ref[:n_out, 2:3])                          # (n_out, tb)


# --------------------------------------------------------------------------
# Wrapper
# --------------------------------------------------------------------------
def _fold_bn(params):
    """Fold eval-mode BatchNorm1d into the downstream Linear (exact algebra)."""
    w1, b1 = params["w1"], params["b1"]
    s1 = params["g1"] * lax.rsqrt(params["rv1"] + EPS)               # (1, f1)
    t1 = params["be1"] - params["rm1"] * s1
    w2 = s1.reshape(-1, 1) * params["w2"]                            # scale rows
    b2 = t1 @ params["w2"] + params["b2"]                            # (1, f2)
    s2 = params["g2"] * lax.rsqrt(params["rv2"] + EPS)               # (1, f2)
    t2 = params["be2"] - params["rm2"] * s2
    w3 = s2.reshape(-1, 1) * params["w3"]
    b3 = t2 @ params["w3"] + params["b3"]                            # (1, n_out)
    return w1, b1, w2, b2, w3, b3


def fcn10_forward(x, params, *, batch_tile=None, small_batch_threshold=256):
    """x: (B, nuym_in) float32. params: fc/bn parameters (eval mode)."""
    B, n_in = x.shape
    w1, b1, w2, b2, w3, b3 = _fold_bn(params)
    f1, f2 = w1.shape[1], w2.shape[1]
    n_out = w3.shape[1]
    f_max = max(f1, f2, n_out)

    flops = 2 * B * (n_in * f1 + f1 * f2 + f2 * n_out)
    transcendentals = B * (f1 + f2)  # tanh
    bytes_accessed = 4 * (x.size + w1.size + w2.size + w3.size
                          + 3 * f_max + B * n_out)
    cost = pl.CostEstimate(flops=flops, transcendentals=transcendentals,
                           bytes_accessed=bytes_accessed)

    # ---------------------------------------------------------------------
    # Small batch: batch-major, no grid, whole problem VMEM-resident.
    # (Skips the wrapper transposes; footprint is tiny, so we do NOT set
    #  vmem_limit_bytes below the compiler's default scoped limit.)
    # ---------------------------------------------------------------------
    if batch_tile is None and B <= small_batch_threshold:
        bias = jnp.zeros((3, f_max), jnp.float32)
        bias = bias.at[0, :f1].set(b1[0])
        bias = bias.at[1, :f2].set(b2[0])
        bias = bias.at[2, :n_out].set(b3[0])
        kernel = functools.partial(_fcn10_kernel_bm, f1=f1, f2=f2, n_out=n_out)
        vmem = pl.BlockSpec(memory_space=pltpu.MemorySpace.VMEM)
        return pl.pallas_call(
            kernel,
            out_shape=jax.ShapeDtypeStruct((B, n_out), jnp.float32),
            in_specs=[vmem] * 5,
            out_specs=vmem,
            cost_estimate=cost,
        )(x, w1, w2, w3, bias)

    # ---------------------------------------------------------------------
    # Large batch: feature-major grid path. Batch lives on the lane axis
    # (tiles are multiples of 128), weights/bias stay VMEM-resident
    # (constant-index blocks), batch axis marked "parallel".
    # ---------------------------------------------------------------------
    n_cores = _tensorcores_per_chip()
    tb_max = 4096 if n_cores == 2 else 8192  # single-TC chips: fewer, bigger steps
    if batch_tile is not None:
        tb = _round_up(min(int(batch_tile), tb_max), 128)
        grid_len = pl.cdiv(B, tb)
    else:
        grid_len = max(n_cores, pl.cdiv(B, tb_max))
        if n_cores == 2 and grid_len % 2:
            grid_len += 1  # keep both v7x TensorCores evenly loaded
        tb = _round_up(pl.cdiv(B, grid_len), 128)
        grid_len = pl.cdiv(B, tb)

    xT = x.T                              # (n_in, B)   -- tiny wrapper transpose
    w1T, w2T, w3T = w1.T, w2.T, w3.T      # pre-transposed once at trace time
    bias = jnp.zeros((f_max, 3), jnp.float32)  # column j = bias of layer j
    bias = bias.at[:f1, 0].set(b1[0])
    bias = bias.at[:f2, 1].set(b2[0])
    bias = bias.at[:n_out, 2].set(b3[0])

    kernel = functools.partial(_fcn10_kernel_fm, f1=f1, f2=f2, n_out=n_out)

    footprint = (2 * _padded_bytes((n_in, tb))          # double-buffered x tiles
                 + 2 * _padded_bytes((n_out, tb))       # double-buffered out tiles
                 + _padded_bytes((f1, tb))              # h1 intermediate
                 + _padded_bytes((f2, tb))              # h2 intermediate
                 + 2 * (_padded_bytes(w1T.shape) + _padded_bytes(w2T.shape)
                        + _padded_bytes(w3T.shape) + _padded_bytes(bias.shape)))
    cap = _vmem_capacity_bytes()
    # Never below the compiler default scoped limit; never near physical VMEM.
    vmem_limit = int(min(max(32 << 20, 2 * footprint + (4 << 20)),
                         cap - (16 << 20)))

    # NOTE: when B % tb != 0 the last step reads garbage input columns; columns
    # (batch rows) are independent and Pallas masks the out-of-range output
    # writeback, so this is safe. Do not add a batch-dim reduction here without
    # revisiting that assumption.
    # TODO(synk): if grid_len ever gets large and DMA latency is exposed, add
    #             pipeline_mode=pl.Buffered(3) on the xT BlockSpec.
    oT = pl.pallas_call(
        kernel,
        out_shape=jax.ShapeDtypeStruct((n_out, B), jnp.float32),
        grid_spec=pltpu.PrefetchScalarGridSpec(
            num_scalar_prefetch=0,
            grid=(grid_len,),
            in_specs=[
                pl.BlockSpec((n_in, tb), lambda i: (0, i)),
                pl.BlockSpec(w1T.shape, lambda i: (0, 0)),
                pl.BlockSpec(w2T.shape, lambda i: (0, 0)),
                pl.BlockSpec(w3T.shape, lambda i: (0, 0)),
                pl.BlockSpec(bias.shape, lambda i: (0, 0)),
            ],
            out_specs=pl.BlockSpec((n_out, tb), lambda i: (0, i)),
        ),
        compiler_params=pltpu.CompilerParams(
            dimension_semantics=("parallel",),
            vmem_limit_bytes=vmem_limit),
        cost_estimate=cost,
    )(xT, w1T, w2T, w3T, bias)
    return oT.T                           # back to (B, n_out)


# --------------------------------------------------------------------------
# Parameter construction & pure-JAX reference (un-folded BN math)
# --------------------------------------------------------------------------
def xavier_uniform(key, fan_in, fan_out):
    limit = jnp.sqrt(6.0 / (fan_in + fan_out))
    # stored as (in, out) -- transposed vs PyTorch's (out, in) Linear weight
    return jax.random.uniform(key, (fan_in, fan_out), jnp.float32, -limit, limit)


def make_params(key, nuym_in, fc1_out, fc2_out):
    ks = jax.random.split(key, 10)
    p = {}
    # fc layers (xavier_uniform weights, bias = 0.0001, matching init_layers)
    p["w1"] = xavier_uniform(ks[0], nuym_in, fc1_out)
    p["b1"] = jnp.full((1, fc1_out), 1e-4, jnp.float32)
    p["w2"] = xavier_uniform(ks[1], fc1_out, fc2_out)
    p["b2"] = jnp.full((1, fc2_out), 1e-4, jnp.float32)
    p["w3"] = xavier_uniform(ks[2], fc2_out, 6)
    p["b3"] = jnp.full((1, 6), 1e-4, jnp.float32)
    # BatchNorm1d parameters / running stats (deterministic, non-trivial)
    p["g1"] = 1.0 + 0.2 * jax.random.normal(ks[3], (1, fc1_out), jnp.float32)
    p["be1"] = 0.1 * jax.random.normal(ks[4], (1, fc1_out), jnp.float32)
    p["rm1"] = 0.1 * jax.random.normal(ks[5], (1, fc1_out), jnp.float32)
    p["rv1"] = 1.0 + 0.5 * jax.random.uniform(ks[6], (1, fc1_out), jnp.float32)
    p["g2"] = 1.0 + 0.2 * jax.random.normal(ks[7], (1, fc2_out), jnp.float32)
    p["be2"] = 0.1 * jax.random.normal(ks[8], (1, fc2_out), jnp.float32)
    p["rm2"] = 0.1 * jax.random.normal(ks[9], (1, fc2_out), jnp.float32)
    p["rv2"] = 1.0 + 0.5 * jax.random.uniform(jax.random.fold_in(key, 99),
                                              (1, fc2_out), jnp.float32)
    return p


def _reference(x, p):
    h1 = jnp.tanh(x @ p["w1"] + p["b1"])
    h1 = (h1 - p["rm1"]) * lax.rsqrt(p["rv1"] + EPS) * p["g1"] + p["be1"]
    h2 = jnp.tanh(h1 @ p["w2"] + p["b2"])
    h2 = (h2 - p["rm2"]) * lax.rsqrt(p["rv2"] + EPS) * p["g2"] + p["be2"]
    return h2 @ p["w3"] + p["b3"]


if __name__ == "__main__":
    # Wine dataset: 13 features, 6 output classes (per fc3).
    NUYM_IN, FC1_OUT, FC2_OUT = 13, 32, 16

    key = jax.random.PRNGKey(0)
    kx, kp, kx2, kx3 = jax.random.split(key, 4)
    params = make_params(kp, NUYM_IN, FC1_OUT, FC2_OUT)

    # --- Small-batch path (batch-major, no grid, whole problem in VMEM) ---
    B = 8
    x = jax.random.normal(kx, (B, NUYM_IN), jnp.float32)
    out = fcn10_forward(x, params)
    jax.block_until_ready(out)
    ref = _reference(x, params)
    assert out.shape == (B, 6)
    assert jnp.max(jnp.abs(out - ref)) < 1e-4

    # --- Large-batch path (feature-major, core-aware auto tiling) ---
    B2 = 1024
    x2 = jax.random.normal(kx2, (B2, NUYM_IN), jnp.float32)
    out2 = fcn10_forward(x2, params)
    jax.block_until_ready(out2)
    ref2 = _reference(x2, params)
    assert out2.shape == (B2, 6)
    assert jnp.max(jnp.abs(out2 - ref2)) < 1e-4

    # --- Ragged batch + forced small tile: multi-step grid + partial-tile mask ---
    B3 = 1000
    x3 = jax.random.normal(kx3, (B3, NUYM_IN), jnp.float32)
    out3 = fcn10_forward(x3, params, batch_tile=256)
    jax.block_until_ready(out3)
    ref3 = _reference(x3, params)
    assert out3.shape == (B3, 6)
    assert jnp.max(jnp.abs(out3 - ref3)) < 1e-4

    print("KERNEL_OK")
</pallas_src>

<mosaic_0001>
module attributes {stable_mosaic.version = 11 : i64} {
  func.func @_fcn10_kernel_bm(%arg0: memref<8x13xf32, #tpu.memory_space<vmem>>, %arg1: memref<13x32xf32, #tpu.memory_space<vmem>>, %arg2: memref<32x16xf32, #tpu.memory_space<vmem>>, %arg3: memref<16x6xf32, #tpu.memory_space<vmem>>, %arg4: memref<3x32xf32, #tpu.memory_space<vmem>>, %arg5: memref<8x6xf32, #tpu.memory_space<vmem>>) attributes {dimension_semantics = [], scalar_prefetch = 0 : i64, scratch_operands = 0 : i64, tpu.core_type = #tpu.core_type<tc>} {
    %c0 = arith.constant 0 : index
    %c0_0 = arith.constant 0 : index
    %0 = vector.load %arg0[%c0, %c0_0] : memref<8x13xf32, #tpu.memory_space<vmem>>, vector<8x13xf32>
    %c0_1 = arith.constant 0 : index
    %c0_2 = arith.constant 0 : index
    %1 = vector.load %arg1[%c0_1, %c0_2] : memref<13x32xf32, #tpu.memory_space<vmem>>, vector<13x32xf32>
    %cst = arith.constant dense<0.000000e+00> : vector<8x32xf32>
    %2 = tpu.matmul %0, %1, %cst {dimension_numbers = #tpu.dot_dimension_numbers<[1], [0], [0], [1], [0, 0, 1, 1], [], []>} : vector<8x13xf32>, vector<13x32xf32>, vector<8x32xf32> -> vector<8x32xf32>
    %c0_3 = arith.constant 0 : index
    %c0_4 = arith.constant 0 : index
    %3 = vector.load %arg4[%c0_3, %c0_4] : memref<3x32xf32, #tpu.memory_space<vmem>>, vector<1x32xf32>
    %4 = vector.broadcast %3 : vector<1x32xf32> to vector<8x32xf32>
    %5 = arith.addf %2, %4 : vector<8x32xf32>
    %6 = math.tanh %5 : vector<8x32xf32>
    %c0_5 = arith.constant 0 : index
    %c0_6 = arith.constant 0 : index
    %7 = vector.load %arg2[%c0_5, %c0_6] : memref<32x16xf32, #tpu.memory_space<vmem>>, vector<32x16xf32>
    %cst_7 = arith.constant dense<0.000000e+00> : vector<8x16xf32>
    %8 = tpu.matmul %6, %7, %cst_7 {dimension_numbers = #tpu.dot_dimension_numbers<[1], [0], [0], [1], [0, 0, 1, 1], [], []>} : vector<8x32xf32>, vector<32x16xf32>, vector<8x16xf32> -> vector<8x16xf32>
    %c1 = arith.constant 1 : index
    %c0_8 = arith.constant 0 : index
    %9 = vector.load %arg4[%c1, %c0_8] : memref<3x32xf32, #tpu.memory_space<vmem>>, vector<1x16xf32>
    %10 = vector.broadcast %9 : vector<1x16xf32> to vector<8x16xf32>
    %11 = arith.addf %8, %10 : vector<8x16xf32>
    %12 = math.tanh %11 : vector<8x16xf32>
    %c0_9 = arith.constant 0 : index
    %c0_10 = arith.constant 0 : index
    %13 = vector.load %arg3[%c0_9, %c0_10] : memref<16x6xf32, #tpu.memory_space<vmem>>, vector<16x6xf32>
    %cst_11 = arith.constant dense<0.000000e+00> : vector<8x6xf32>
    %14 = tpu.matmul %12, %13, %cst_11 {dimension_numbers = #tpu.dot_dimension_numbers<[1], [0], [0], [1], [0, 0, 1, 1], [], []>} : vector<8x16xf32>, vector<16x6xf32>, vector<8x6xf32> -> vector<8x6xf32>
    %c2 = arith.constant 2 : index
    %c0_12 = arith.constant 0 : index
    %15 = vector.load %arg4[%c2, %c0_12] : memref<3x32xf32, #tpu.memory_space<vmem>>, vector<1x6xf32>
    %16 = vector.broadcast %15 : vector<1x6xf32> to vector<8x6xf32>
    %17 = arith.addf %14, %16 : vector<8x6xf32>
    %c0_13 = arith.constant 0 : index
    %c0_14 = arith.constant 0 : index
    %18 = vector.load %arg5[%c0_13, %c0_14] : memref<8x6xf32, #tpu.memory_space<vmem>>, vector<8x6xf32>
    tpu.vector_store %arg5[%c0_13, %c0_14], %17 {strides = array<i32>} : memref<8x6xf32, #tpu.memory_space<vmem>>, vector<8x6xf32>,
    return
  }
}

</mosaic_0001>

<bundles_post_ra>
// kernel: tpu_custom_call.1
= control target key start
LH: loop header
LB: loop body
LE: loop exit
PB: predicated region body
PF: predicated region fallthrough
CT: control target
= control target key end

     0   :  { %vm33_vm0 = vcmask 1044480   ;;  %v361_v1 = vmov 0.0   ;;  %vm362_vm1 = vmmov 0   ;;  %s433_s0 = inlined_call_operand.vmem [shape: f32[8,13], index: 0, kind: input, shape index: {}]   ;;  %s434_s1 = inlined_call_operand.vmem [shape: f32[13,32], index: 1, kind: input, shape index: {}]   ;;  %s435_s2 = inlined_call_operand.vmem [shape: f32[32,16], index: 2, kind: input, shape index: {}]   ;;  %s436_s3 = inlined_call_operand.vmem [shape: f32[16,6], index: 3, kind: input, shape index: {}]   ;;  %s437_s4 = inlined_call_operand.vmem [shape: f32[3,32], index: 4, kind: input, shape index: {}]   ;;  %s438_s5 = inlined_call_operand.hbm [shape: f32[8,6], index: 5, kind: output, shape index: {}]  }
   0x1   :  { %v23_v0 = vld [vmem:[%s434_s1 + $0x8] sm:$0x1f]  ;;  %307 = vmatprep.subr.mxu0 %v361_v1  ;;  %v22_v2 = vld [vmem:[%s434_s1] sm:$0xff]  ;;  %311 = vmatprep.mubr.msk.f32.mxu0 %vm362_vm1, %v361_v1 }
   0x2   :  { %10 = vsyncpa [#allocation3], 0  ;;  %308 = vmatpush3.msk.msra.mxu0 %vm33_vm0, %v23_v0  ;;  %v21_v3 = vld [vmem:[%s433_s0] sm:$0xff]  ;;  %vm29_vm2 = vcmask 105472   ;;  %314 = vmatprep.subr.mxu1 %v361_v1  ;;  %v111_v4 = vld [vmem:[%s435_s2 + $0x18] sm:$0xff]  ;;  %vm117_vm3 = vcmask 261120  }
   0x3   :  { %309 = vmatprep.subr.mxu0 %v361_v1  ;;  %322 = vmatprep.mubr.msk.f32.mxu1 %vm362_vm1, %v361_v1  ;;  %v110_v5 = vld [vmem:[%s435_s2 + $0x10] sm:$0xff]  ;;  %v109_v6 = vld [vmem:[%s435_s2 + $0x8] sm:$0xff]  ;;  %v108_v7 = vld [vmem:[%s435_s2] sm:$0xff]  ;;  %vm199_vm4 = vcmask 130048   ;;  %s363_s14 = smov [#allocation2]   ;;  %vm273_vm5 = vcmask 48128  }
   0x4   :  { %310 = vmatpush3.msra.mxu0 %v22_v2  ;;  %315 = vmatpush3.msra.mxu1 %v111_v4  ;;  %v289_v8 = vld [vmem:[%s437_s4] ss:$0 sm:$0xff]  ;;  %v193_v13 = vld [vmem:[%s436_s3 + $0x8] sm:$0xff]  ;;  %v292_v15 = vld [vmem:[%s437_s4 + $0x1] ss:$0 sm:$0xff] }
   0x5   :  { %312 = vmatmul.mubr.msk.f32.vlgmr.msra.gmra.mxu0 %vm29_vm2, %v21_v3  ;;  %325 = vmatprep.subr.mxu0 %v361_v1  ;;  %v192_v14 = vld [vmem:[%s436_s3] sm:$0xff]  ;;  %s281_s3 = sshll.u32 %s363_s14, 4  ;;  %s282_s3 = int_to_ptr.vmem [resolvable:$true] %s281_s3 }
   0x6   :  { %329 = vmatprep.mubr.msk.f32.mxu0 %vm362_vm1, %v361_v1  ;;  %316 = vmatprep.subr.mxu1 %v361_v1  ;;  %v294_v20 = vld [vmem:[%s437_s4 + $0x2] ss:$0 sm:$0xff]  ;;  %s339_s15 = scalar_lea.vmem %s282_s3, 128  ;;  %p344_p1 = scmp.lt.s32.totalorder %s282_s3, %s282_s3 }
   0x7   :  { %317 = vmatpush3.msra.mxu1 %v110_v5  ;;  %326 = vmatpush3.msra.mxu0 %v193_v13  ;;  %p340_p0 = scmp.ne.s32.totalorder %s282_s3, %s339_s15  ;;  %p345_p2 = scmp.lt.s32.totalorder %s339_s15, %s339_s15 }
   0x8   :  { %318 = vmatprep.subr.mxu1 %v361_v1  ;;  %327 = vmatprep.subr.mxu0 %v361_v1 }
   0x9   :  { %319 = vmatpush3.msra.mxu1 %v109_v6  ;;  %328 = vmatpush3.msra.mxu0 %v192_v14  ;;  %p346_p3 = por %p345_p2, %p344_p1 }
   0xa   :  { %320 = vmatprep.subr.mxu1 %v361_v1 }
   0xb   :  { %321 = vmatpush3.msra.mxu1 %v108_v7  ;;  %p347_p4 = pnand %p346_p3, %p340_p0 }
  0xc5   :  { %v103_v9 = vpop.f32.mrf.mxu0 }
  0xc6   :  { %v104_v10 = vadd.f32 %v289_v8, %v103_v9 }
  0xc7   :  { %v313_v11 = vpop.f32.mrf.mxu0 }
  0xc8   :  { %335 = vtanh.f32 %v104_v10 }
  0xd5   :  { %v336_v12 = vpop.eup %335 }
  0xd6   :  { %323 = vmatmul.mubr.msk.f32.vlgmr.msra.gmra.mxu1 %vm117_vm3, %v336_v12 }
 0x196   :  { %v187_v16 = vpop.f32.mrf.mxu1 }
 0x197   :  { %v188_v17 = vadd.f32 %v292_v15, %v187_v16 }
 0x198   :  { %v324_v18 = vpop.f32.mrf.mxu1 }
 0x199   :  { %337 = vtanh.f32 %v188_v17 }
 0x1a6   :  { %v338_v19 = vpop.eup %337 }
 0x1a7   :  { %330 = vmatmul.mubr.msk.f32.vlgmr.msra.gmra.mxu0 %vm199_vm4, %v338_v19 }
 0x267   :  { %v269_v21 = vpop.f32.mrf.mxu0 }
 0x268   :  { %v270_v22 = vadd.f32 %v294_v20, %v269_v21 }
 0x269   :  { %v331_v23 = vpop.f32.mrf.mxu0 }
 0x26a   :  { %274 = vst.msk [vmem:[#allocation2] sm:$0xff] %vm273_vm5, %v270_v22 }
 0x26b   :  { %350 = shalt.err (!%p347_p4)
}
 0x26c   :  { %284 = dma.vmem_to_hbm [thread:$0]  %s282_s3, 128, %s438_s5, [#allocation3]  }
 0x26d   :  { %359 = dma.done.wait [#allocation3], 128  }
 0x26e   :  { %360 = vsyncadd [#allocation3], 4294967168 }
 0x26f   :  { %288 = vsyncpa [#allocation3], 1 }

</bundles_post_ra>
